<compile_context>
chip_gen: v7x
topology: tpu7x:2x2x1
jax: 0.10.0
libtpu: 0.0.40
codegen_flags: <defaults>
</compile_context>

<pallas_src>
import jax
import jax.numpy as jnp
from jax.experimental import pallas as pl
from jax.experimental.pallas import tpu as pltpu

# Logical dims of the PyTorch module.
IN_DIM = 3
HID_DIM = 32
OUT_DIM = 10
# Lane-dense widths used for in-kernel math.
PAD_HID = 128
PAD_LOG = 128
# Narrow, contiguous output width actually written back to HBM.
OUT_PAD = 16

NEG_BIG = jnp.float32(-1e30)


def _round_up(n, m):
    return (n + m - 1) // m * m


def mlp_kernel(x_ref, w1_ref, b1_ref, w2_ref, b2_ref, w3_ref, b3_ref, o_ref):
    # fc1: K == 3 -> keep it off the MXU; three broadcast FMAs on the (idle) VPU.
    x = x_ref[...]                                        # (TB, 3) f32
    h1 = (x[:, 0:1] * w1_ref[0:1, :]
          + x[:, 1:2] * w1_ref[1:2, :]
          + x[:, 2:3] * w1_ref[2:3, :]
          + b1_ref[...])                                  # (TB, PAD_HID) f32
    h1 = jnp.maximum(h1, 0.0)

    # fc2 + ReLU: bf16 MXU operands, f32 accumulation & epilogue (v5e-safe).
    h2 = jnp.dot(h1.astype(jnp.bfloat16), w2_ref[...],
                 preferred_element_type=jnp.float32) + b2_ref[...]
    h2 = jnp.maximum(h2, 0.0)

    # fc3: padded lanes carry a -1e30 bias baked into b3p (w3 padding cols are 0),
    # so no iota/compare/select mask is needed here.
    logits = jnp.dot(h2.astype(jnp.bfloat16), w3_ref[...],
                     preferred_element_type=jnp.float32) + b3_ref[...]

    # Softmax over the first OUT_DIM lanes (padded lanes exp(-1e30 - m) == 0).
    m = jnp.max(logits, axis=1, keepdims=True)
    e = jnp.exp(logits - m)
    denom = jnp.sum(e, axis=1, keepdims=True)
    r = pl.reciprocal(denom, approx=True)                 # EUP slot (free)
    r = r * (2.0 - denom * r)                             # one Newton step -> ~exact
    p = e * r                                             # (TB, PAD_LOG) f32
    o_ref[...] = p[:, :OUT_PAD]                           # narrow contiguous store


def _pad_params(params):
    """Zero-pad weights/biases to lane-dense shapes; bf16 for the MXU matmuls.

    The fc3 bias is padded with -1e30 so padded-lane logits are masked out of the
    softmax with no extra in-kernel work (w3 padded columns are exactly zero).
    """
    w1, b1, w2, b2, w3, b3 = params
    w1p = jnp.zeros((IN_DIM, PAD_HID), jnp.float32).at[:, :HID_DIM].set(w1)
    b1p = jnp.zeros((1, PAD_HID), jnp.float32).at[:, :HID_DIM].set(b1.reshape(1, -1))
    w2p = jnp.zeros((PAD_HID, PAD_HID), jnp.float32).at[:HID_DIM, :HID_DIM].set(w2)
    b2p = jnp.zeros((1, PAD_HID), jnp.float32).at[:, :HID_DIM].set(b2.reshape(1, -1))
    w3p = jnp.zeros((PAD_HID, PAD_LOG), jnp.float32).at[:HID_DIM, :OUT_DIM].set(w3)
    b3p = jnp.full((1, PAD_LOG), NEG_BIG, jnp.float32).at[:, :OUT_DIM].set(
        b3.reshape(1, -1))
    return (w1p, b1p,
            w2p.astype(jnp.bfloat16), b2p,
            w3p.astype(jnp.bfloat16), b3p)


def _choose_tb(batch, cap=4096):
    """Adaptive batch tile: big tiles (low per-step overhead), >=2 steps when large."""
    rb = _round_up(batch, 8)
    if rb <= 2048:
        return rb                       # single grid step; no input padding for small B
    # Large batch: guarantee >= 2 grid steps so dimension_semantics=("parallel",)
    # shards across both v7x TensorCores; cap tile so VMEM stays tiny.
    return min(cap, _round_up((rb + 1) // 2, 16))


def simple_nn_forward(x, params, *, tb=None):
    """x: (batch, 3) f32; params: (w1,b1,w2,b2,w3,b3) with weights as (in, out)."""
    batch = x.shape[0]
    TB = tb if tb is not None else _choose_tb(batch)
    padded_batch = _round_up(batch, TB)
    if padded_batch != batch:
        x = jnp.pad(x, ((0, padded_batch - batch), (0, 0)))
    grid = (padded_batch // TB,)

    w1p, b1p, w2p, b2p, w3p, b3p = _pad_params(params)

    x_spec = pl.BlockSpec((TB, IN_DIM), lambda i: (i, 0))
    o_spec = pl.BlockSpec((TB, OUT_PAD), lambda i: (i, 0))

    def const_spec(shape):
        # Constant block index -> weights stay resident in VMEM across grid steps.
        return pl.BlockSpec(shape, lambda i: (0, 0))

    weight_bytes = sum(int(a.size) * a.dtype.itemsize
                       for a in (w1p, b1p, w2p, b2p, w3p, b3p))
    cost = pl.CostEstimate(
        flops=2 * batch * (IN_DIM * HID_DIM + HID_DIM * HID_DIM + HID_DIM * OUT_DIM),
        transcendentals=batch * PAD_LOG,
        bytes_accessed=padded_batch * (IN_DIM * 4 + OUT_PAD * 4) + weight_bytes,
    )

    out = pl.pallas_call(
        mlp_kernel,
        out_shape=jax.ShapeDtypeStruct((padded_batch, OUT_PAD), jnp.float32),
        grid=grid,
        in_specs=[
            x_spec,
            const_spec((IN_DIM, PAD_HID)),
            const_spec((1, PAD_HID)),
            const_spec((PAD_HID, PAD_HID)),
            const_spec((1, PAD_HID)),
            const_spec((PAD_HID, PAD_LOG)),
            const_spec((1, PAD_LOG)),
        ],
        out_specs=o_spec,
        compiler_params=pltpu.CompilerParams(
            dimension_semantics=("parallel",),   # megacore on v7x, no-op elsewhere
        ),
        cost_estimate=cost,
    )(x, w1p, b1p, w2p, b2p, w3p, b3p)

    return out[:batch, :OUT_DIM]


def init_params(key):
    """Deterministic init mimicking PyTorch nn.Linear default U[-1/sqrt(fan_in), +]."""
    dims = [(IN_DIM, HID_DIM), (HID_DIM, HID_DIM), (HID_DIM, OUT_DIM)]
    params = []
    for fan_in, fan_out in dims:
        key, kw, kb = jax.random.split(key, 3)
        bound = 1.0 / jnp.sqrt(float(fan_in))
        w = jax.random.uniform(kw, (fan_in, fan_out), jnp.float32, -bound, bound)
        b = jax.random.uniform(kb, (1, fan_out), jnp.float32, -bound, bound)
        params.extend([w, b])
    return tuple(params)


if __name__ == "__main__":
    key = jax.random.PRNGKey(0)
    key, kx = jax.random.split(key)

    batch = 8
    x = jax.random.normal(kx, (batch, IN_DIM), dtype=jnp.float32)
    params = init_params(key)

    out = jax.block_until_ready(simple_nn_forward(x, params))

    # sanity: shape and (Newton-refined) normalized rows
    assert out.shape == (batch, OUT_DIM)
    assert jnp.allclose(jnp.sum(out, axis=1), 1.0, atol=1e-3)

    # cross-check against plain f32 JAX reference (kernel uses bf16 MXU operands,
    # so tolerance is loosened accordingly)
    w1, b1, w2, b2, w3, b3 = params
    h1 = jnp.maximum(x @ w1 + b1, 0.0)
    h2 = jnp.maximum(h1 @ w2 + b2, 0.0)
    ref = jax.nn.softmax(h2 @ w3 + b3, axis=1)
    assert jnp.allclose(out, ref, atol=2e-2), float(jnp.max(jnp.abs(out - ref)))

    print("KERNEL_OK")
</pallas_src>

<mosaic_0001>
module attributes {stable_mosaic.version = 11 : i64} {
  func.func @mlp_kernel(%arg0: i32, %arg1: memref<8x3xf32, #tpu.memory_space<vmem>>, %arg2: memref<3x128xf32, #tpu.memory_space<vmem>>, %arg3: memref<1x128xf32, #tpu.memory_space<vmem>>, %arg4: memref<128x128xbf16, #tpu.memory_space<vmem>>, %arg5: memref<1x128xf32, #tpu.memory_space<vmem>>, %arg6: memref<128x128xbf16, #tpu.memory_space<vmem>>, %arg7: memref<1x128xf32, #tpu.memory_space<vmem>>, %arg8: memref<8x16xf32, #tpu.memory_space<vmem>>) attributes {dimension_semantics = [#tpu.dimension_semantics<parallel>], iteration_bounds = array<i64: 1>, scalar_prefetch = 0 : i64, scratch_operands = 0 : i64, tpu.core_type = #tpu.core_type<tc>, window_params = [{transform_indices = @transform_0, window_bounds = array<i64: 8, 3>}, {pipeline_mode = #tpu.pipeline_mode<synchronous>, transform_indices = @transform_1, window_bounds = array<i64: 3, 128>}, {pipeline_mode = #tpu.pipeline_mode<synchronous>, transform_indices = @transform_2, window_bounds = array<i64: 1, 128>}, {pipeline_mode = #tpu.pipeline_mode<synchronous>, transform_indices = @transform_3, window_bounds = array<i64: 128, 128>}, {pipeline_mode = #tpu.pipeline_mode<synchronous>, transform_indices = @transform_4, window_bounds = array<i64: 1, 128>}, {pipeline_mode = #tpu.pipeline_mode<synchronous>, transform_indices = @transform_5, window_bounds = array<i64: 128, 128>}, {pipeline_mode = #tpu.pipeline_mode<synchronous>, transform_indices = @transform_6, window_bounds = array<i64: 1, 128>}, {transform_indices = @transform_7, window_bounds = array<i64: 8, 16>}]} {
    %c0 = arith.constant 0 : index
    %c0_0 = arith.constant 0 : index
    %0 = vector.load %arg1[%c0, %c0_0] : memref<8x3xf32, #tpu.memory_space<vmem>>, vector<8x3xf32>
    %1 = vector.extract_strided_slice %0 {offsets = [0, 0], sizes = [8, 1], strides = [1, 1]} : vector<8x3xf32> to vector<8x1xf32>
    %c0_1 = arith.constant 0 : index
    %c0_2 = arith.constant 0 : index
    %2 = vector.load %arg2[%c0_1, %c0_2] : memref<3x128xf32, #tpu.memory_space<vmem>>, vector<1x128xf32>
    %3 = vector.broadcast %1 : vector<8x1xf32> to vector<8x128xf32>
    %4 = vector.broadcast %2 : vector<1x128xf32> to vector<8x128xf32>
    %5 = arith.mulf %3, %4 : vector<8x128xf32>
    %6 = vector.extract_strided_slice %0 {offsets = [0, 1], sizes = [8, 1], strides = [1, 1]} : vector<8x3xf32> to vector<8x1xf32>
    %c1 = arith.constant 1 : index
    %c0_3 = arith.constant 0 : index
    %7 = vector.load %arg2[%c1, %c0_3] : memref<3x128xf32, #tpu.memory_space<vmem>>, vector<1x128xf32>
    %8 = vector.broadcast %6 : vector<8x1xf32> to vector<8x128xf32>
    %9 = vector.broadcast %7 : vector<1x128xf32> to vector<8x128xf32>
    %10 = arith.mulf %8, %9 : vector<8x128xf32>
    %11 = arith.addf %5, %10 : vector<8x128xf32>
    %12 = vector.extract_strided_slice %0 {offsets = [0, 2], sizes = [8, 1], strides = [1, 1]} : vector<8x3xf32> to vector<8x1xf32>
    %c2 = arith.constant 2 : index
    %c0_4 = arith.constant 0 : index
    %13 = vector.load %arg2[%c2, %c0_4] : memref<3x128xf32, #tpu.memory_space<vmem>>, vector<1x128xf32>
    %14 = vector.broadcast %12 : vector<8x1xf32> to vector<8x128xf32>
    %15 = vector.broadcast %13 : vector<1x128xf32> to vector<8x128xf32>
    %16 = arith.mulf %14, %15 : vector<8x128xf32>
    %17 = arith.addf %11, %16 : vector<8x128xf32>
    %c0_5 = arith.constant 0 : index
    %c0_6 = arith.constant 0 : index
    %18 = vector.load %arg3[%c0_5, %c0_6] : memref<1x128xf32, #tpu.memory_space<vmem>>, vector<1x128xf32>
    %19 = vector.broadcast %18 : vector<1x128xf32> to vector<8x128xf32>
    %20 = arith.addf %17, %19 : vector<8x128xf32>
    %cst = arith.constant 0.000000e+00 : f32
    %21 = vector.broadcast %cst : f32 to vector<8x128xf32>
    %22 = arith.maximumf %20, %21 : vector<8x128xf32>
    %23 = arith.truncf %22 : vector<8x128xf32> to vector<8x128xbf16>
    %c0_7 = arith.constant 0 : index
    %c0_8 = arith.constant 0 : index
    %24 = vector.load %arg4[%c0_7, %c0_8] : memref<128x128xbf16, #tpu.memory_space<vmem>>, vector<128x128xbf16>
    %cst_9 = arith.constant dense<0.000000e+00> : vector<8x128xf32>
    %25 = tpu.matmul %23, %24, %cst_9 {dimension_numbers = #tpu.dot_dimension_numbers<[1], [0], [0], [1], [0, 0, 1, 1], [], []>} : vector<8x128xbf16>, vector<128x128xbf16>, vector<8x128xf32> -> vector<8x128xf32>
    %c0_10 = arith.constant 0 : index
    %c0_11 = arith.constant 0 : index
    %26 = vector.load %arg5[%c0_10, %c0_11] : memref<1x128xf32, #tpu.memory_space<vmem>>, vector<1x128xf32>
    %27 = vector.broadcast %26 : vector<1x128xf32> to vector<8x128xf32>
    %28 = arith.addf %25, %27 : vector<8x128xf32>
    %cst_12 = arith.constant 0.000000e+00 : f32
    %29 = vector.broadcast %cst_12 : f32 to vector<8x128xf32>
    %30 = arith.maximumf %28, %29 : vector<8x128xf32>
    %31 = arith.truncf %30 : vector<8x128xf32> to vector<8x128xbf16>
    %c0_13 = arith.constant 0 : index
    %c0_14 = arith.constant 0 : index
    %32 = vector.load %arg6[%c0_13, %c0_14] : memref<128x128xbf16, #tpu.memory_space<vmem>>, vector<128x128xbf16>
    %cst_15 = arith.constant dense<0.000000e+00> : vector<8x128xf32>
    %33 = tpu.matmul %31, %32, %cst_15 {dimension_numbers = #tpu.dot_dimension_numbers<[1], [0], [0], [1], [0, 0, 1, 1], [], []>} : vector<8x128xbf16>, vector<128x128xbf16>, vector<8x128xf32> -> vector<8x128xf32>
    %c0_16 = arith.constant 0 : index
    %c0_17 = arith.constant 0 : index
    %34 = vector.load %arg7[%c0_16, %c0_17] : memref<1x128xf32, #tpu.memory_space<vmem>>, vector<1x128xf32>
    %35 = vector.broadcast %34 : vector<1x128xf32> to vector<8x128xf32>
    %36 = arith.addf %33, %35 : vector<8x128xf32>
    %cst_18 = arith.constant dense<0xFF800000> : vector<8xf32>
    %37 = vector.multi_reduction <maximumf>, %36, %cst_18 [1] : vector<8x128xf32> to vector<8xf32>
    %38 = vector.shape_cast %37 : vector<8xf32> to vector<8x1xf32>
    %39 = vector.broadcast %38 : vector<8x1xf32> to vector<8x128xf32>
    %40 = arith.subf %36, %39 : vector<8x128xf32>
    %41 = math.exp %40 : vector<8x128xf32>
    %cst_19 = arith.constant dense<0.000000e+00> : vector<8xf32>
    %42 = vector.multi_reduction <add>, %41, %cst_19 [1] : vector<8x128xf32> to vector<8xf32>
    %43 = vector.shape_cast %42 : vector<8xf32> to vector<8x1xf32>
    %44 = tpu.reciprocal %43 {approx = true} : vector<8x1xf32> -> vector<8x1xf32>
    %45 = arith.mulf %43, %44 : vector<8x1xf32>
    %cst_20 = arith.constant 2.000000e+00 : f32
    %46 = vector.broadcast %cst_20 : f32 to vector<8x1xf32>
    %47 = arith.subf %46, %45 : vector<8x1xf32>
    %48 = arith.mulf %44, %47 : vector<8x1xf32>
    %49 = vector.broadcast %48 : vector<8x1xf32> to vector<8x128xf32>
    %50 = arith.mulf %41, %49 : vector<8x128xf32>
    %51 = vector.extract_strided_slice %50 {offsets = [0, 0], sizes = [8, 16], strides = [1, 1]} : vector<8x128xf32> to vector<8x16xf32>
    %c0_21 = arith.constant 0 : index
    %c0_22 = arith.constant 0 : index
    %52 = vector.load %arg8[%c0_21, %c0_22] : memref<8x16xf32, #tpu.memory_space<vmem>>, vector<8x16xf32>
    tpu.vector_store %arg8[%c0_21, %c0_22], %51 {strides = array<i32>} : memref<8x16xf32, #tpu.memory_space<vmem>>, vector<8x16xf32>,
    return
  }
  func.func @transform_0(%arg0: i32) -> (i32, i32) {
    %c0_i32 = arith.constant 0 : i32
    %c0_i32_0 = arith.constant 0 : i32
    return %arg0, %c0_i32 : i32, i32
  }
  func.func @transform_1(%arg0: i32) -> (i32, i32) {
    %c0_i32 = arith.constant 0 : i32
    %c0_i32_0 = arith.constant 0 : i32
    %c0_i32_1 = arith.constant 0 : i32
    return %c0_i32, %c0_i32_0 : i32, i32
  }
  func.func @transform_2(%arg0: i32) -> (i32, i32) {
    %c0_i32 = arith.constant 0 : i32
    %c0_i32_0 = arith.constant 0 : i32
    %c0_i32_1 = arith.constant 0 : i32
    return %c0_i32, %c0_i32_0 : i32, i32
  }
  func.func @transform_3(%arg0: i32) -> (i32, i32) {
    %c0_i32 = arith.constant 0 : i32
    %c0_i32_0 = arith.constant 0 : i32
    %c0_i32_1 = arith.constant 0 : i32
    return %c0_i32, %c0_i32_0 : i32, i32
  }
  func.func @transform_4(%arg0: i32) -> (i32, i32) {
    %c0_i32 = arith.constant 0 : i32
    %c0_i32_0 = arith.constant 0 : i32
    %c0_i32_1 = arith.constant 0 : i32
    return %c0_i32, %c0_i32_0 : i32, i32
  }
  func.func @transform_5(%arg0: i32) -> (i32, i32) {
    %c0_i32 = arith.constant 0 : i32
    %c0_i32_0 = arith.constant 0 : i32
    %c0_i32_1 = arith.constant 0 : i32
    return %c0_i32, %c0_i32_0 : i32, i32
  }
  func.func @transform_6(%arg0: i32) -> (i32, i32) {
    %c0_i32 = arith.constant 0 : i32
    %c0_i32_0 = arith.constant 0 : i32
    %c0_i32_1 = arith.constant 0 : i32
    return %c0_i32, %c0_i32_0 : i32, i32
  }
  func.func @transform_7(%arg0: i32) -> (i32, i32) {
    %c0_i32 = arith.constant 0 : i32
    %c0_i32_0 = arith.constant 0 : i32
    return %arg0, %c0_i32 : i32, i32
  }
}

</mosaic_0001>

<bundles_post_ra>
// kernel: tpu_custom_call.1
= control target key start
LH: loop header
LB: loop body
LE: loop exit
PB: predicated region body
PF: predicated region fallthrough
CT: control target
= control target key end

     0   :  { %12 = vsyncpa [#allocation3], 0  ;;  %s665_s0 = inlined_call_operand.vmem [shape: f32[8,3], index: 0, kind: input, shape index: {}]   ;;  %s666_s1 = inlined_call_operand.vmem [shape: f32[3,128], index: 1, kind: input, shape index: {}]   ;;  %s667_s2 = inlined_call_operand.vmem [shape: f32[1,128], index: 2, kind: input, shape index: {}]   ;;  %s668_s3 = inlined_call_operand.hbm [shape: bf16[128,128], index: 3, kind: input, shape index: {}]   ;;  %s669_s4 = inlined_call_operand.vmem [shape: f32[1,128], index: 4, kind: input, shape index: {}]   ;;  %s670_s5 = inlined_call_operand.hbm [shape: bf16[128,128], index: 5, kind: input, shape index: {}]   ;;  %s671_s6 = inlined_call_operand.vmem [shape: f32[1,128], index: 6, kind: input, shape index: {}]   ;;  %s672_s7 = inlined_call_operand.hbm [shape: f32[8,16], index: 7, kind: output, shape index: {}]  }
   0x1   :  { %13 = vsyncpa [#allocation6], 0 }
   0x2   :  { %14 = vsyncpa [#allocation4], 0  ;;  %s540_s24 = smov [#allocation2]   ;;  %s468_s28 = scalar_lea.hbm %s668_s3, 1024 }
   0x3   :  { %s26_s25 = sshll.u32 %s540_s24, 4  ;;  %p469_p0 = scmp.ne.s32.totalorder %s668_s3, %s468_s28  ;;  %s27_s25 = int_to_ptr.vmem [resolvable:$true] %s26_s25 }
   0x4   :  { %p472_p1 = scmp.lt.u32.totalorder %s468_s28, %s668_s3 }
   0x6   :  { %p474_p2 = pnand %p472_p1, %p469_p0 }
   0x8   :  { %477 = shalt.err (!%p474_p2)
}
   0x9   :  { %s478_s10 = scalar_lea.vmem %s27_s25, 1024  ;;  %p483_p4 = scmp.lt.s32.totalorder %s27_s25, %s27_s25 }
   0xa   :  { %p479_p3 = scmp.ne.s32.totalorder %s27_s25, %s478_s10  ;;  %p484_p5 = scmp.lt.s32.totalorder %s478_s10, %s478_s10 }
   0xc   :  { %p485_p6 = por %p484_p5, %p483_p4 }
   0xe   :  { %p486_p7 = pnand %p485_p6, %p479_p3 }
  0x10   :  { %489 = shalt.err (!%p486_p7)
}
  0x11   :  { %s541_s11 = smov 64   ;;  %s542_s12 = smov 4  }
  0x12   :  { %32 = dma.hbm_to_vmem [thread:$0]  %s668_s3, 1024, %s27_s25, [#allocation3], %s541_s11, %s541_s11, %s542_s12  }
  0x13   :  { %s543_s15 = smov [#allocation5]   ;;  %s490_s19 = scalar_lea.hbm %s670_s5, 1024 }
  0x14   :  { %s40_s16 = sshll.u32 %s543_s15, 4  ;;  %p491_p8 = scmp.ne.s32.totalorder %s670_s5, %s490_s19  ;;  %s41_s16 = int_to_ptr.vmem [resolvable:$true] %s40_s16 }
  0x15   :  { %p494_p9 = scmp.lt.u32.totalorder %s490_s19, %s670_s5 }
  0x17   :  { %p496_p10 = pnand %p494_p9, %p491_p8 }
  0x19   :  { %499 = shalt.err (!%p496_p10)
}
  0x1a   :  { %s500_s24 = scalar_lea.vmem %s41_s16, 1024  ;;  %p505_p12 = scmp.lt.s32.totalorder %s41_s16, %s41_s16 }
  0x1b   :  { %p501_p11 = scmp.ne.s32.totalorder %s41_s16, %s500_s24  ;;  %p506_p13 = scmp.lt.s32.totalorder %s500_s24, %s500_s24 }
  0x1d   :  { %p507_p0 = por %p506_p13, %p505_p12 }
  0x1f   :  { %p508_p1 = pnand %p507_p0, %p501_p11 }
  0x21   :  { %511 = shalt.err (!%p508_p1)
}
  0x22   :  { %46 = dma.hbm_to_vmem [thread:$0]  %s670_s5, 1024, %s41_s16, [#allocation6], %s541_s11, %s541_s11, %s542_s12  }
  0x23   :  { %534 = dma.done.wait [#allocation3], 1024  }
  0x24   :  { %535 = vsyncadd [#allocation3], 4294966272 }
  0x25   :  { %536 = dma.done.wait [#allocation6], 1024  }
  0x26   :  { %537 = vsyncadd [#allocation6], 4294966272  ;;  %v544_v0 = vmov 0   ;;  %v545_v1 = vmov 2   ;;  %v546_v2 = vmov 0.0   ;;  %v56_v3 = vld [vmem:[%s665_s0] sm:$0xff] }
  0x27   :  { %444 = vset.pattern.permute.xlu0 %v544_v0  ;;  %446 = vset.pattern.permute.xlu1 %v545_v1  ;;  %v448_v4 = vld [vmem:[#allocation2] sm:$0xff]   ;;  %v449_v5 = vld [vmem:[#allocation2 + $0x8] sm:$0xff]   ;;  %v547_v6 = vmov 1   ;;  %v450_v7 = vld [vmem:[#allocation2 + $0x10] sm:$0xff]   ;;  %vm548_vm0 = vmmov 0   ;;  %vm336_vm1 = vcmask 130048  }
  0x28   :  { %394 = vmatprep.subr.bf16.mxu0 %v546_v2  ;;  %414 = vmatprep.subr.bf16.mxu1 %v546_v2  ;;  %v451_v8 = vld [vmem:[#allocation2 + $0x18] sm:$0xff]   ;;  %v452_v9 = vld [vmem:[#allocation2 + $0x20] sm:$0xff]   ;;  %v453_v11 = vld [vmem:[#allocation2 + $0x28] sm:$0xff]  }
  0x29   :  { %60 = vperm.xlu0 %444, %v56_v3   ;;  %81 = vperm.xlu1 %446, %v56_v3   ;;  %v456_v10 = vld [vmem:[#allocation5] sm:$0xff]   ;;  %v457_v12 = vld [vmem:[#allocation5 + $0x8] sm:$0xff]   ;;  %v454_v13 = vld [vmem:[#allocation2 + $0x30] sm:$0xff]  }
  0x2a   :  { %395 = vmatpush3.bf16.msra.mxu0 %v448_v4  ;;  %410 = vmatprep.mubr.msk.bf16.mxu0 %vm548_vm0, %v546_v2  ;;  %v458_v14 = vld [vmem:[#allocation5 + $0x10] sm:$0xff]   ;;  %v455_v15 = vld [vmem:[#allocation2 + $0x38] sm:$0xff]   ;;  %v460_v17 = vld [vmem:[#allocation5 + $0x20] sm:$0xff]  }
  0x2b   :  { %396 = vmatprep.subr.bf16.mxu0 %v546_v2  ;;  %430 = vmatprep.mubr.msk.bf16.mxu1 %vm548_vm0, %v546_v2  ;;  %v459_v16 = vld [vmem:[#allocation5 + $0x18] sm:$0xff]   ;;  %v461_v18 = vld [vmem:[#allocation5 + $0x28] sm:$0xff]   ;;  %v354_v20 = vld [vmem:[%s666_s1] ss:$0 sm:$0xff] }
  0x2c   :  { %415 = vmatpush3.bf16.msra.mxu1 %v456_v10  ;;  %v355_v21 = vld [vmem:[%s666_s1 + $0x1] ss:$0 sm:$0xff]  ;;  %v356_v22 = vld [vmem:[%s666_s1 + $0x2] ss:$0 sm:$0xff]  ;;  %v357_v29 = vld [vmem:[%s667_s2] ss:$0 sm:$0xff] }
  0x2d   :  { %445 = vset.pattern.permute.xlu0 %v547_v6  ;;  %416 = vmatprep.subr.bf16.mxu1 %v546_v2  ;;  %v462_v34 = vld [vmem:[#allocation5 + $0x30] sm:$0xff]   ;;  %v463_v35 = vld [vmem:[#allocation5 + $0x38] sm:$0xff]   ;;  %v358_v36 = vld [vmem:[%s669_s4] ss:$0 sm:$0xff]  ;;  %s549_s4 = smov [#allocation7]  }
  0x2e   :  { %70 = vperm.xlu0 %445, %v56_v3   ;;  %397 = vmatpush3.bf16.msra.mxu0 %v449_v5  ;;  %v367_v44 = vld [vmem:[%s671_s6] ss:$0 sm:$0xff]  ;;  %s344_s13 = sshll.u32 %s549_s4, 4  ;;  %s345_s13 = int_to_ptr.vmem [resolvable:$true] %s344_s13 }
  0x2f   :  { %398 = vmatprep.subr.bf16.mxu0 %v546_v2  ;;  %s512_s6 = scalar_lea.vmem %s345_s13, 128  ;;  %p517_p3 = scmp.lt.s32.totalorder %s345_s13, %s345_s13 }
  0x30   :  { %417 = vmatpush3.bf16.msra.mxu1 %v457_v12  ;;  %p513_p2 = scmp.ne.s32.totalorder %s345_s13, %s512_s6  ;;  %p518_p4 = scmp.lt.s32.totalorder %s512_s6, %s512_s6 }
  0x31   :  { %418 = vmatprep.subr.bf16.mxu1 %v546_v2 }
  0x32   :  { %447 = vset.pattern.permute.xlu0 %v545_v1  ;;  %399 = vmatpush3.bf16.msra.mxu0 %v450_v7  ;;  %p519_p5 = por %p518_p4, %p517_p3 }
  0x33   :  { %400 = vmatprep.subr.bf16.mxu0 %v546_v2 }
  0x34   :  { %419 = vmatpush3.bf16.msra.mxu1 %v458_v14  ;;  %p520_p6 = pnand %p519_p5, %p513_p2 }
  0x35   :  { %420 = vmatprep.subr.bf16.mxu1 %v546_v2 }
  0x36   :  { %401 = vmatpush3.bf16.msra.mxu0 %v451_v8 }
  0x37   :  { %402 = vmatprep.subr.bf16.mxu0 %v546_v2 }
  0x38   :  { %421 = vmatpush3.bf16.msra.mxu1 %v459_v16 }
  0x39   :  { %422 = vmatprep.subr.bf16.mxu1 %v546_v2 }
  0x3a   :  { %403 = vmatpush3.bf16.msra.mxu0 %v452_v9 }
  0x3b   :  { %404 = vmatprep.subr.bf16.mxu0 %v546_v2 }
  0x3c   :  { %423 = vmatpush3.bf16.msra.mxu1 %v460_v17 }
  0x3d   :  { %424 = vmatprep.subr.bf16.mxu1 %v546_v2 }
  0x3e   :  { %405 = vmatpush3.bf16.msra.mxu0 %v453_v11 }
  0x3f   :  { %406 = vmatprep.subr.bf16.mxu0 %v546_v2 }
  0x40   :  { %425 = vmatpush3.bf16.msra.mxu1 %v461_v18 }
  0x41   :  { %426 = vmatprep.subr.bf16.mxu1 %v546_v2 }
  0x42   :  { %407 = vmatpush3.bf16.msra.mxu0 %v454_v13 }
  0x43   :  { %408 = vmatprep.subr.bf16.mxu0 %v546_v2 }
  0x44   :  { %427 = vmatpush3.bf16.msra.mxu1 %v462_v34 }
  0x45   :  { %428 = vmatprep.subr.bf16.mxu1 %v546_v2 }
  0x46   :  { %409 = vmatpush3.bf16.msra.mxu0 %v455_v15 }
  0x48   :  { %429 = vmatpush3.bf16.msra.mxu1 %v463_v35 }
  0xa8   :  { %v61_v19 = vpop.permute.xlu0 %60  ;;  %v82_v23 = vpop.permute.xlu1 %81 }
  0xa9   :  { %v67_v25 = vmul.f32 %v354_v20, %v61_v19  ;;  %v88_v27 = vmul.f32 %v356_v22, %v82_v23 }
  0xad   :  { %v71_v24 = vpop.permute.xlu0 %70 }
  0xae   :  { %v77_v26 = vmul.f32 %v355_v21, %v71_v24 }
  0xb0   :  { %v78_v28 = vadd.f32 %v77_v26, %v67_v25 }
  0xb2   :  { %v89_v30 = vadd.f32 %v88_v27, %v78_v28 }
  0xb4   :  { %v97_v31 = vadd.f32 %v357_v29, %v89_v30 }
  0xb6   :  { %v98_v32 = vmax.f32 %v97_v31, 0.0 }
  0xb8   :  { %v99_v33 = vpack.c.bf16 %v98_v32, %v98_v32 }
  0xba   :  { %411 = vmatmul.mubr.bf16.vlgmr.msra.gmra.mrb[0].mxu0 %v99_v33 }
 0x18d   :  { %v205_v37 = vpop.f32.mrb[0].mxu0 }
 0x18e   :  { %v206_v38 = vadd.f32 %v358_v36, %v205_v37  ;;  %v412_v39 = vpop.f32.mrb[1].mxu0 }
 0x18f   :  { %v208_v40 = vpop.f32.mrb[2].mxu0 }
 0x190   :  { %v211_v41 = vmax.f32 %v206_v38, 0.0  ;;  %v413_v42 = vpop.f32.mrb[3].mxu0 }
 0x192   :  { %v212_v43 = vpack.c.bf16 %v211_v41, %v211_v41 }
 0x194   :  { %431 = vmatmul.mubr.bf16.vlgmr.msra.gmra.mrb[0].mxu1 %v212_v43 }
 0x267   :  { %v318_v45 = vpop.f32.mrb[0].mxu1 }
 0x268   :  { %v319_v46 = vadd.f32 %v367_v44, %v318_v45  ;;  %v432_v47 = vpop.f32.mrb[1].mxu1 }
 0x269   :  { %v321_v48 = vpop.f32.mrb[2].mxu1 }
 0x26a   :  { %324 = vmax.xlane.f32.xlu1 %v319_v46  ;;  %v433_v49 = vpop.f32.mrb[3].mxu1 }
 0x2f7   :  { %v325_v50 = vpop.xlane.xlu1 %324 }
 0x2f8   :  { %v326_v51 = vsub.f32 %v319_v46, %v325_v50 }
 0x2fa   :  { %v327_v52 = vmul.f32 1.442695, %v326_v51 }
 0x2fc   :  { %464 = vpow2.f32 %v327_v52 }
 0x306   :  { %v465_v53 = vpop.eup %464 }
 0x307   :  { %329 = vadd.xlane.f32.xlu0 %v465_v53 }
 0x394   :  { %v330_v54 = vpop.xlane.xlu0 %329 }
 0x395   :  { %466 = vrcp.f32 %v330_v54 }
 0x39f   :  { %v467_v55 = vpop.eup %466 }
 0x3a0   :  { %v332_v56 = vmul.f32 %v467_v55, %v330_v54 }
 0x3a2   :  { %v333_v57 = vsub.f32 2.0, %v332_v56 }
 0x3a4   :  { %v334_v58 = vmul.f32 %v467_v55, %v333_v57 }
 0x3a6   :  { %v335_v59 = vmul.f32 %v465_v53, %v334_v58 }
 0x3a8   :  { %337 = vst.msk [vmem:[#allocation7] sm:$0xff] %vm336_vm1, %v335_v59 }
 0x3a9   :  { %523 = shalt.err (!%p520_p6)
}
 0x3aa   :  { %s524_s16 = scalar_lea.hbm %s672_s7, 128 }
 0x3ab   :  { %p525_p7 = scmp.ne.s32.totalorder %s672_s7, %s524_s16  ;;  %p528_p8 = scmp.lt.u32.totalorder %s524_s16, %s672_s7 }
 0x3ad   :  { %p530_p9 = pnand %p528_p8, %p525_p7 }
 0x3af   :  { %533 = shalt.err (!%p530_p9)
}
 0x3b0   :  { %347 = dma.vmem_to_hbm [thread:$0]  %s345_s13, 128, %s672_s7, [#allocation4]  }
 0x3b1   :  { %538 = dma.done.wait [#allocation4], 128  }
 0x3b2   :  { %539 = vsyncadd [#allocation4], 4294967168 }
 0x3b3   :  { %351 = vsyncpa [#allocation3], 1 }
 0x3b4   :  { %352 = vsyncpa [#allocation6], 1 }
 0x3b5   :  { %353 = vsyncpa [#allocation4], 1 }

</bundles_post_ra>
